<compile_context>
chip_gen: v5e
topology: v5e:2x2
jax: 0.10.0
libtpu: 0.0.40
codegen_flags: <defaults>
</compile_context>

<pallas_src>
import functools
import math

import jax
import jax.numpy as jnp
from jax.experimental import pallas as pl
from jax.experimental.pallas import tpu as pltpu

EMBED_DIM = 32          # embed_dim % 8 == 0
N_HEAD = 8
HEAD_DIM = EMBED_DIM // N_HEAD
MASK_NEG = -1e30        # finite "-inf": keeps fully-masked rows NaN-free


def self_attention_kernel(x_ref, bias_ref,
                          wq_ref, bq_ref, wk_ref, bk_ref, wv_ref, bv_ref,
                          wp_ref, bp_ref, o_ref, *, batch_block, seq_len):
    """One block of `batch_block` batch elements per grid step.

    x_ref    : (batch_block*T, C)   compute dtype (bf16)
    bias_ref : (batch_block, T, T)  f32 additive mask (0 keep / -1e30 drop)
    wq/wk/wv : (H, C, hd)           compute dtype (1/sqrt(hd) folded into wq)
    bq/bk/bv : (H, 1, hd)           f32
    wp       : (H, hd, C)           compute dtype
    bp       : (1, C)               f32
    o_ref    : (batch_block*T, C)
    """
    T = seq_len
    H = wq_ref.shape[0]
    R, C = x_ref.shape

    wq, wk, wv = wq_ref[...], wk_ref[...], wv_ref[...]
    bq, bk, bv = bq_ref[...], bk_ref[...], bv_ref[...]
    wp = wp_ref[...].astype(jnp.float32)
    bp = bp_ref[...]

    # Head-batched QKV projections over ALL rows of the block (f32 accumulate).
    x = x_ref[...]                                     # (R, C)
    xh = jnp.broadcast_to(x, (H, R, C))                # head-batched view
    q_all = jnp.einsum('hrc,hcd->hrd', xh, wq,
                       preferred_element_type=jnp.float32) + bq    # (H, R, hd)
    k_all = jnp.einsum('hrc,hcd->hrd', xh, wk,
                       preferred_element_type=jnp.float32) + bk
    v_all = jnp.einsum('hrc,hcd->hrd', xh, wv,
                       preferred_element_type=jnp.float32) + bv

    for b in range(batch_block):                       # static unroll (small)
        lo, hi = b * T, (b + 1) * T
        q = q_all[:, lo:hi, :]                         # (H, T, hd) aligned row slices
        k = k_all[:, lo:hi, :]
        v = v_all[:, lo:hi, :]

        # Scores for all heads at once; scale already folded into wq/bq.
        att = jnp.einsum('htd,hsd->hts', q, k,
                         preferred_element_type=jnp.float32)        # (H, T, T)
        att = att + bias_ref[b][None, :, :]            # mask shared across heads

        # Numerically-stable softmax, all in f32.
        att = att - jnp.max(att, axis=-1, keepdims=True)
        p = jnp.exp(att)
        p = p * pl.reciprocal(jnp.sum(p, axis=-1, keepdims=True), approx=True)

        y = jnp.einsum('hts,hsd->htd', p, v,
                       preferred_element_type=jnp.float32)          # (H, T, hd)

        # Head concat folded into the output projection: out = sum_h y_h @ wp_h.
        out = jnp.einsum('htd,hdc->htc', y, wp,
                         preferred_element_type=jnp.float32)        # (H, T, C)
        out = jnp.sum(out, axis=0) + bp                             # (T, C)
        o_ref[pl.ds(lo, T), :] = out.astype(o_ref.dtype)


def _prep_params(params, compute_dtype):
    """Per-head, pre-transposed weights so the kernel never splits lanes.

    Returns (wq_h, bq_h, wk_h, bk_h, wv_h, bv_h, wp_h, bp) with
      wq_h/wk_h/wv_h : (H, C, hd)   q_h[h] = x @ wq_h[h] + bq_h[h]
      wp_h           : (H, hd, C)   out    = sum_h y_h @ wp_h[h] + bp
    The 1/sqrt(head_dim) attention scale is folded into wq_h / bq_h.
    """
    (wq, bq), (wk, bk), (wv, bv), (wp, bp) = params
    C = wq.shape[0]
    hd = C // N_HEAD
    scale = 1.0 / math.sqrt(hd)

    def split_in(w, b, s=1.0):
        # nn.Linear stores W as (out, in); forward is x @ W.T + b.
        w_h = (w.T * s).reshape(C, N_HEAD, hd).transpose(1, 0, 2)   # (H, C, hd)
        b_h = (b * s).reshape(N_HEAD, 1, hd)                        # (H, 1, hd)
        return w_h.astype(compute_dtype), b_h.astype(jnp.float32)

    wq_h, bq_h = split_in(wq, bq, scale)     # fold 1/sqrt(hd) into Q
    wk_h, bk_h = split_in(wk, bk)
    wv_h, bv_h = split_in(wv, bv)
    wp_h = wp.T.reshape(N_HEAD, hd, C).astype(compute_dtype)        # (H, hd, C)
    bp_r = bp.reshape(1, C).astype(jnp.float32)
    return (wq_h, bq_h, wk_h, bk_h, wv_h, bv_h, wp_h, bp_r)


def _mask_to_bias(src_mask, B, T):
    """src_mask (broadcastable to (B, 1, T, T)) -> (B, T, T) f32 additive bias."""
    m = jnp.asarray(src_mask)
    if m.dtype != jnp.bool_:
        m = m != 0
    if m.ndim == 4:
        if m.shape[1] != 1:
            # TODO(synk): per-head src_mask not supported by this kernel
            raise NotImplementedError("per-head src_mask not supported")
        m = m[:, 0]
    m = jnp.broadcast_to(m, (B, T, T))
    return jnp.where(m, 0.0, MASK_NEG).astype(jnp.float32)


def self_attention(x, src_mask, params, *,
                   compute_dtype=jnp.bfloat16, batch_block=None):
    """x: (B, T, C) f32.  src_mask: bool, broadcastable to (B, 1, T, T)."""
    B, T, C = x.shape
    assert C == EMBED_DIM and C % N_HEAD == 0

    if batch_block is None:
        # Batch rows per step but keep >= 2 grid steps (v7x has 2 TensorCores).
        batch_block = B if B == 1 else max(1, B // 2)
    while B % batch_block:
        batch_block -= 1
    if (batch_block * T) % 8 != 0:
        batch_block = B                       # full-extent rows satisfy the (8,128) rule
    n_blocks = B // batch_block
    rows_blk = batch_block * T

    bias = _mask_to_bias(src_mask, B, T)
    prepped = _prep_params(params, compute_dtype)
    x2 = x.reshape(B * T, C).astype(compute_dtype)

    def const_spec(a):                        # grid-invariant full-array block
        return pl.BlockSpec(a.shape, lambda *_, nd=a.ndim: (0,) * nd)

    kernel = functools.partial(self_attention_kernel,
                               batch_block=batch_block, seq_len=T)

    out = pl.pallas_call(
        kernel,
        out_shape=jax.ShapeDtypeStruct((B * T, C), x.dtype),
        grid_spec=pltpu.PrefetchScalarGridSpec(
            num_scalar_prefetch=0,
            grid=(n_blocks,),
            in_specs=[
                pl.BlockSpec((rows_blk, C), lambda i: (i, 0)),             # x rows
                pl.BlockSpec((batch_block, T, T), lambda i: (i, 0, 0)),    # mask bias
            ] + [const_spec(a) for a in prepped],                          # weights/biases
            out_specs=pl.BlockSpec((rows_blk, C), lambda i: (i, 0)),
        ),
        compiler_params=pltpu.CompilerParams(
            dimension_semantics=("parallel",)),
    )(x2, bias, *prepped)
    return out.reshape(B, T, C)


# ---------------------------------------------------------------------------
# References
# ---------------------------------------------------------------------------
def ref_self_attention(x, src_mask, params):
    """Pure-JAX f32 reference mirroring the PyTorch forward (eval mode)."""
    B, T, C = x.shape
    (wq, bq), (wk, bk), (wv, bv), (wp, bp) = params

    def lin(t, w, b):
        return t @ w.T + b

    def split_heads(t):
        return t.reshape(B, T, N_HEAD, HEAD_DIM).transpose(0, 2, 1, 3)

    q = split_heads(lin(x, wq, bq))
    k = split_heads(lin(x, wk, bk))
    v = split_heads(lin(x, wv, bv))
    att = jnp.einsum('bhtd,bhsd->bhts', q, k) * (1.0 / math.sqrt(HEAD_DIM))
    mask = jnp.broadcast_to(jnp.asarray(src_mask, bool), att.shape)
    att = jnp.where(mask, att, -jnp.inf)
    att = jax.nn.softmax(att, axis=-1)
    y = jnp.einsum('bhts,bhsd->bhtd', att, v)
    y = y.transpose(0, 2, 1, 3).reshape(B, T, C)
    return lin(y, wp, bp)


def ref_from_prepped(x, bias, prepped, compute_dtype):
    """f32 reference on the kernel's bf16-quantized weights/inputs (tight check)."""
    wq_h, bq_h, wk_h, bk_h, wv_h, bv_h, wp_h, bp = [
        jnp.asarray(a).astype(jnp.float32) for a in prepped]
    xq = x.astype(compute_dtype).astype(jnp.float32)
    q = jnp.einsum('btc,hcd->bhtd', xq, wq_h) + bq_h[None]
    k = jnp.einsum('btc,hcd->bhtd', xq, wk_h) + bk_h[None]
    v = jnp.einsum('btc,hcd->bhtd', xq, wv_h) + bv_h[None]
    att = jnp.einsum('bhtd,bhsd->bhts', q, k) + bias[:, None]
    att = jax.nn.softmax(att, axis=-1)
    y = jnp.einsum('bhts,bhsd->bhtd', att, v)
    return jnp.einsum('bhtd,hdc->btc', y, wp_h) + bp[None]


def init_params(key, embed_dim):
    keys = jax.random.split(key, 8)
    def linear(kw, kb):
        w = 0.02 * jax.random.normal(kw, (embed_dim, embed_dim), jnp.float32)
        b = 0.02 * jax.random.normal(kb, (embed_dim,), jnp.float32)
        return w, b
    return tuple(linear(keys[2 * i], keys[2 * i + 1]) for i in range(4))


if __name__ == "__main__":
    B, T, C = 2, 8, EMBED_DIM

    root = jax.random.PRNGKey(0)
    k_params, k_x = jax.random.split(root)
    params = init_params(k_params, C)
    x = jax.random.normal(k_x, (B, T, C), jnp.float32)

    # causal-style src_mask: (B, 1, T, T), every row has >=1 True element
    src_mask = jnp.broadcast_to(
        jnp.tril(jnp.ones((T, T), dtype=bool))[None, None], (B, 1, T, T))

    out = self_attention(x, src_mask, params)
    out = jax.block_until_ready(out)
    assert out.shape == (B, T, C)
    assert not bool(jnp.any(jnp.isnan(out)))

    # Tight check against a reference that mirrors the kernel's bf16 quantization.
    bias = _mask_to_bias(src_mask, B, T)
    prepped = _prep_params(params, jnp.bfloat16)
    ref_q = ref_from_prepped(x, bias, prepped, jnp.bfloat16)
    assert jnp.allclose(out, ref_q, atol=1e-3, rtol=1e-3), "mismatch vs quantized reference"

    # Looser check against the faithful f32 PyTorch-semantics reference.
    ref = ref_self_attention(x, src_mask, params)
    assert jnp.allclose(out, ref, atol=5e-3, rtol=5e-3), "mismatch vs f32 reference"

    print("KERNEL_OK")
</pallas_src>

<mosaic_0001>
module attributes {stable_mosaic.version = 11 : i64} {
  func.func @self_attention_kernel(%arg0: i32, %arg1: memref<8x32xbf16, #tpu.memory_space<vmem>>, %arg2: memref<1x8x8xf32, #tpu.memory_space<vmem>>, %arg3: memref<8x32x4xbf16, #tpu.memory_space<vmem>>, %arg4: memref<8x1x4xf32, #tpu.memory_space<vmem>>, %arg5: memref<8x32x4xbf16, #tpu.memory_space<vmem>>, %arg6: memref<8x1x4xf32, #tpu.memory_space<vmem>>, %arg7: memref<8x32x4xbf16, #tpu.memory_space<vmem>>, %arg8: memref<8x1x4xf32, #tpu.memory_space<vmem>>, %arg9: memref<8x4x32xbf16, #tpu.memory_space<vmem>>, %arg10: memref<1x32xf32, #tpu.memory_space<vmem>>, %arg11: memref<8x32xf32, #tpu.memory_space<vmem>>) attributes {dimension_semantics = [#tpu.dimension_semantics<parallel>], iteration_bounds = array<i64: 2>, scalar_prefetch = 0 : i64, scratch_operands = 0 : i64, tpu.core_type = #tpu.core_type<tc>, window_params = [{transform_indices = @transform_0, window_bounds = array<i64: 8, 32>}, {transform_indices = @transform_1, window_bounds = array<i64: 1, 8, 8>}, {pipeline_mode = #tpu.pipeline_mode<synchronous>, transform_indices = @transform_2, window_bounds = array<i64: 8, 32, 4>}, {pipeline_mode = #tpu.pipeline_mode<synchronous>, transform_indices = @transform_3, window_bounds = array<i64: 8, 1, 4>}, {pipeline_mode = #tpu.pipeline_mode<synchronous>, transform_indices = @transform_4, window_bounds = array<i64: 8, 32, 4>}, {pipeline_mode = #tpu.pipeline_mode<synchronous>, transform_indices = @transform_5, window_bounds = array<i64: 8, 1, 4>}, {pipeline_mode = #tpu.pipeline_mode<synchronous>, transform_indices = @transform_6, window_bounds = array<i64: 8, 32, 4>}, {pipeline_mode = #tpu.pipeline_mode<synchronous>, transform_indices = @transform_7, window_bounds = array<i64: 8, 1, 4>}, {pipeline_mode = #tpu.pipeline_mode<synchronous>, transform_indices = @transform_8, window_bounds = array<i64: 8, 4, 32>}, {pipeline_mode = #tpu.pipeline_mode<synchronous>, transform_indices = @transform_9, window_bounds = array<i64: 1, 32>}, {transform_indices = @transform_10, window_bounds = array<i64: 8, 32>}]} {
    %c0 = arith.constant 0 : index
    %c0_0 = arith.constant 0 : index
    %c0_1 = arith.constant 0 : index
    %0 = vector.load %arg3[%c0, %c0_0, %c0_1] : memref<8x32x4xbf16, #tpu.memory_space<vmem>>, vector<8x32x4xbf16>
    %c0_2 = arith.constant 0 : index
    %c0_3 = arith.constant 0 : index
    %c0_4 = arith.constant 0 : index
    %1 = vector.load %arg5[%c0_2, %c0_3, %c0_4] : memref<8x32x4xbf16, #tpu.memory_space<vmem>>, vector<8x32x4xbf16>
    %c0_5 = arith.constant 0 : index
    %c0_6 = arith.constant 0 : index
    %c0_7 = arith.constant 0 : index
    %2 = vector.load %arg7[%c0_5, %c0_6, %c0_7] : memref<8x32x4xbf16, #tpu.memory_space<vmem>>, vector<8x32x4xbf16>
    %c0_8 = arith.constant 0 : index
    %c0_9 = arith.constant 0 : index
    %c0_10 = arith.constant 0 : index
    %3 = vector.load %arg4[%c0_8, %c0_9, %c0_10] : memref<8x1x4xf32, #tpu.memory_space<vmem>>, vector<8x1x4xf32>
    %c0_11 = arith.constant 0 : index
    %c0_12 = arith.constant 0 : index
    %c0_13 = arith.constant 0 : index
    %4 = vector.load %arg6[%c0_11, %c0_12, %c0_13] : memref<8x1x4xf32, #tpu.memory_space<vmem>>, vector<8x1x4xf32>
    %c0_14 = arith.constant 0 : index
    %c0_15 = arith.constant 0 : index
    %c0_16 = arith.constant 0 : index
    %5 = vector.load %arg8[%c0_14, %c0_15, %c0_16] : memref<8x1x4xf32, #tpu.memory_space<vmem>>, vector<8x1x4xf32>
    %c0_17 = arith.constant 0 : index
    %c0_18 = arith.constant 0 : index
    %c0_19 = arith.constant 0 : index
    %6 = vector.load %arg9[%c0_17, %c0_18, %c0_19] : memref<8x4x32xbf16, #tpu.memory_space<vmem>>, vector<8x4x32xbf16>
    %7 = arith.extf %6 : vector<8x4x32xbf16> to vector<8x4x32xf32>
    %c0_20 = arith.constant 0 : index
    %c0_21 = arith.constant 0 : index
    %8 = vector.load %arg10[%c0_20, %c0_21] : memref<1x32xf32, #tpu.memory_space<vmem>>, vector<1x32xf32>
    %c0_22 = arith.constant 0 : index
    %c0_23 = arith.constant 0 : index
    %9 = vector.load %arg1[%c0_22, %c0_23] : memref<8x32xbf16, #tpu.memory_space<vmem>>, vector<8x32xbf16>
    %10 = vector.shape_cast %9 : vector<8x32xbf16> to vector<1x8x32xbf16>
    %11 = vector.broadcast %10 : vector<1x8x32xbf16> to vector<8x8x32xbf16>
    "tpu.trace_start"() <{level = 10 : i32, message = "hrc,hcd->hrd"}> : () -> ()
    %cst = arith.constant dense<0.000000e+00> : vector<8x8x4xf32>
    %12 = tpu.matmul %11, %0, %cst {dimension_numbers = #tpu.dot_dimension_numbers<[2], [1], [1], [2], [0, 0, 0, 1, 1, 2], [0], [0]>} : vector<8x8x32xbf16>, vector<8x32x4xbf16>, vector<8x8x4xf32> -> vector<8x8x4xf32>
    "tpu.trace_stop"() : () -> ()
    %13 = vector.broadcast %3 : vector<8x1x4xf32> to vector<8x8x4xf32>
    %14 = arith.addf %12, %13 : vector<8x8x4xf32>
    "tpu.trace_start"() <{level = 10 : i32, message = "hrc,hcd->hrd"}> : () -> ()
    %cst_24 = arith.constant dense<0.000000e+00> : vector<8x8x4xf32>
    %15 = tpu.matmul %11, %1, %cst_24 {dimension_numbers = #tpu.dot_dimension_numbers<[2], [1], [1], [2], [0, 0, 0, 1, 1, 2], [0], [0]>} : vector<8x8x32xbf16>, vector<8x32x4xbf16>, vector<8x8x4xf32> -> vector<8x8x4xf32>
    "tpu.trace_stop"() : () -> ()
    %16 = vector.broadcast %4 : vector<8x1x4xf32> to vector<8x8x4xf32>
    %17 = arith.addf %15, %16 : vector<8x8x4xf32>
    "tpu.trace_start"() <{level = 10 : i32, message = "hrc,hcd->hrd"}> : () -> ()
    %cst_25 = arith.constant dense<0.000000e+00> : vector<8x8x4xf32>
    %18 = tpu.matmul %11, %2, %cst_25 {dimension_numbers = #tpu.dot_dimension_numbers<[2], [1], [1], [2], [0, 0, 0, 1, 1, 2], [0], [0]>} : vector<8x8x32xbf16>, vector<8x32x4xbf16>, vector<8x8x4xf32> -> vector<8x8x4xf32>
    "tpu.trace_stop"() : () -> ()
    %19 = vector.broadcast %5 : vector<8x1x4xf32> to vector<8x8x4xf32>
    %20 = arith.addf %18, %19 : vector<8x8x4xf32>
    "tpu.trace_start"() <{level = 10 : i32, message = "htd,hsd->hts"}> : () -> ()
    %cst_26 = arith.constant dense<0.000000e+00> : vector<8x8x8xf32>
    %21 = tpu.matmul %14, %17, %cst_26 {dimension_numbers = #tpu.dot_dimension_numbers<[2], [2], [1], [1], [0, 0, 0, 1, 1, 1], [0], [0]>} : vector<8x8x4xf32>, vector<8x8x4xf32>, vector<8x8x8xf32> -> vector<8x8x8xf32>
    "tpu.trace_stop"() : () -> ()
    %c0_27 = arith.constant 0 : index
    %c0_28 = arith.constant 0 : index
    %c0_29 = arith.constant 0 : index
    %22 = vector.load %arg2[%c0_27, %c0_28, %c0_29] : memref<1x8x8xf32, #tpu.memory_space<vmem>>, vector<1x8x8xf32>
    %23 = vector.shape_cast %22 : vector<1x8x8xf32> to vector<8x8xf32>
    %24 = vector.shape_cast %23 : vector<8x8xf32> to vector<1x8x8xf32>
    %25 = vector.broadcast %24 : vector<1x8x8xf32> to vector<8x8x8xf32>
    %26 = arith.addf %21, %25 : vector<8x8x8xf32>
    %cst_30 = arith.constant dense<0xFF800000> : vector<8x8xf32>
    %27 = vector.multi_reduction <maximumf>, %26, %cst_30 [2] : vector<8x8x8xf32> to vector<8x8xf32>
    %28 = vector.shape_cast %27 : vector<8x8xf32> to vector<8x8x1xf32>
    %29 = vector.broadcast %28 : vector<8x8x1xf32> to vector<8x8x8xf32>
    %30 = arith.subf %26, %29 : vector<8x8x8xf32>
    %31 = math.exp %30 : vector<8x8x8xf32>
    %cst_31 = arith.constant dense<0.000000e+00> : vector<8x8xf32>
    %32 = vector.multi_reduction <add>, %31, %cst_31 [2] : vector<8x8x8xf32> to vector<8x8xf32>
    %33 = vector.shape_cast %32 : vector<8x8xf32> to vector<8x8x1xf32>
    %34 = tpu.reciprocal %33 {approx = true} : vector<8x8x1xf32> -> vector<8x8x1xf32>
    %35 = vector.broadcast %34 : vector<8x8x1xf32> to vector<8x8x8xf32>
    %36 = arith.mulf %31, %35 : vector<8x8x8xf32>
    "tpu.trace_start"() <{level = 10 : i32, message = "hts,hsd->htd"}> : () -> ()
    %cst_32 = arith.constant dense<0.000000e+00> : vector<8x8x4xf32>
    %37 = tpu.matmul %36, %20, %cst_32 {dimension_numbers = #tpu.dot_dimension_numbers<[2], [1], [1], [2], [0, 0, 0, 1, 1, 2], [0], [0]>} : vector<8x8x8xf32>, vector<8x8x4xf32>, vector<8x8x4xf32> -> vector<8x8x4xf32>
    "tpu.trace_stop"() : () -> ()
    "tpu.trace_start"() <{level = 10 : i32, message = "htd,hdc->htc"}> : () -> ()
    %cst_33 = arith.constant dense<0.000000e+00> : vector<8x8x32xf32>
    %38 = tpu.matmul %37, %7, %cst_33 {dimension_numbers = #tpu.dot_dimension_numbers<[2], [1], [1], [2], [0, 0, 0, 1, 1, 2], [0], [0]>} : vector<8x8x4xf32>, vector<8x4x32xf32>, vector<8x8x32xf32> -> vector<8x8x32xf32>
    "tpu.trace_stop"() : () -> ()
    %cst_34 = arith.constant dense<0.000000e+00> : vector<8x32xf32>
    %39 = vector.multi_reduction <add>, %38, %cst_34 [0] : vector<8x8x32xf32> to vector<8x32xf32>
    %40 = vector.broadcast %8 : vector<1x32xf32> to vector<8x32xf32>
    %41 = arith.addf %39, %40 : vector<8x32xf32>
    %c0_35 = arith.constant 0 : index
    %c0_36 = arith.constant 0 : index
    %42 = vector.load %arg11[%c0_35, %c0_36] : memref<8x32xf32, #tpu.memory_space<vmem>>, vector<8x32xf32>
    tpu.vector_store %arg11[%c0_35, %c0_36], %41 {strides = array<i32>} : memref<8x32xf32, #tpu.memory_space<vmem>>, vector<8x32xf32>,
    return
  }
  func.func @transform_0(%arg0: i32) -> (i32, i32) {
    %c0_i32 = arith.constant 0 : i32
    %c0_i32_0 = arith.constant 0 : i32
    return %arg0, %c0_i32 : i32, i32
  }
  func.func @transform_1(%arg0: i32) -> (i32, i32, i32) {
    %c0_i32 = arith.constant 0 : i32
    %c0_i32_0 = arith.constant 0 : i32
    %c0_i32_1 = arith.constant 0 : i32
    return %arg0, %c0_i32, %c0_i32_0 : i32, i32, i32
  }
  func.func @transform_2(%arg0: i32) -> (i32, i32, i32) {
    %c0_i32 = arith.constant 0 : i32
    %c0_i32_0 = arith.constant 0 : i32
    %c0_i32_1 = arith.constant 0 : i32
    %c0_i32_2 = arith.constant 0 : i32
    return %c0_i32, %c0_i32_0, %c0_i32_1 : i32, i32, i32
  }
  func.func @transform_3(%arg0: i32) -> (i32, i32, i32) {
    %c0_i32 = arith.constant 0 : i32
    %c0_i32_0 = arith.constant 0 : i32
    %c0_i32_1 = arith.constant 0 : i32
    %c0_i32_2 = arith.constant 0 : i32
    return %c0_i32, %c0_i32_0, %c0_i32_1 : i32, i32, i32
  }
  func.func @transform_4(%arg0: i32) -> (i32, i32, i32) {
    %c0_i32 = arith.constant 0 : i32
    %c0_i32_0 = arith.constant 0 : i32
    %c0_i32_1 = arith.constant 0 : i32
    %c0_i32_2 = arith.constant 0 : i32
    return %c0_i32, %c0_i32_0, %c0_i32_1 : i32, i32, i32
  }
  func.func @transform_5(%arg0: i32) -> (i32, i32, i32) {
    %c0_i32 = arith.constant 0 : i32
    %c0_i32_0 = arith.constant 0 : i32
    %c0_i32_1 = arith.constant 0 : i32
    %c0_i32_2 = arith.constant 0 : i32
    return %c0_i32, %c0_i32_0, %c0_i32_1 : i32, i32, i32
  }
  func.func @transform_6(%arg0: i32) -> (i32, i32, i32) {
    %c0_i32 = arith.constant 0 : i32
    %c0_i32_0 = arith.constant 0 : i32
    %c0_i32_1 = arith.constant 0 : i32
    %c0_i32_2 = arith.constant 0 : i32
    return %c0_i32, %c0_i32_0, %c0_i32_1 : i32, i32, i32
  }
  func.func @transform_7(%arg0: i32) -> (i32, i32, i32) {
    %c0_i32 = arith.constant 0 : i32
    %c0_i32_0 = arith.constant 0 : i32
    %c0_i32_1 = arith.constant 0 : i32
    %c0_i32_2 = arith.constant 0 : i32
    return %c0_i32, %c0_i32_0, %c0_i32_1 : i32, i32, i32
  }
  func.func @transform_8(%arg0: i32) -> (i32, i32, i32) {
    %c0_i32 = arith.constant 0 : i32
    %c0_i32_0 = arith.constant 0 : i32
    %c0_i32_1 = arith.constant 0 : i32
    %c0_i32_2 = arith.constant 0 : i32
    return %c0_i32, %c0_i32_0, %c0_i32_1 : i32, i32, i32
  }
  func.func @transform_9(%arg0: i32) -> (i32, i32) {
    %c0_i32 = arith.constant 0 : i32
    %c0_i32_0 = arith.constant 0 : i32
    %c0_i32_1 = arith.constant 0 : i32
    return %c0_i32, %c0_i32_0 : i32, i32
  }
  func.func @transform_10(%arg0: i32) -> (i32, i32) {
    %c0_i32 = arith.constant 0 : i32
    %c0_i32_0 = arith.constant 0 : i32
    return %arg0, %c0_i32 : i32, i32
  }
}

</mosaic_0001>

<bundles_post_ra>
// kernel: tpu_custom_call.1
= control target key start
LH: loop header
LB: loop body
LE: loop exit
PB: predicated region body
PF: predicated region fallthrough
CT: control target
= control target key end

     0   :  { %15 = vsyncpa [#allocation3], 0  ;;  %s2972_s0 = inlined_call_operand.vmem [shape: bf16[16,32], index: 0, kind: input, shape index: {}]   ;;  %s2973_s1 = inlined_call_operand.vmem [shape: f32[2,8,8], index: 1, kind: input, shape index: {}]   ;;  %s2974_s2 = inlined_call_operand.vmem [shape: bf16[8,32,4], index: 2, kind: input, shape index: {}]   ;;  %s2975_s3 = inlined_call_operand.vmem [shape: f32[8,1,4], index: 3, kind: input, shape index: {}]   ;;  %s2976_s4 = inlined_call_operand.vmem [shape: bf16[8,32,4], index: 4, kind: input, shape index: {}]   ;;  %s2977_s5 = inlined_call_operand.vmem [shape: f32[8,1,4], index: 5, kind: input, shape index: {}]   ;;  %s2978_s6 = inlined_call_operand.vmem [shape: bf16[8,32,4], index: 6, kind: input, shape index: {}]   ;;  %s2979_s7 = inlined_call_operand.vmem [shape: f32[8,1,4], index: 7, kind: input, shape index: {}]   ;;  %s2980_s8 = inlined_call_operand.vmem [shape: bf16[8,4,32], index: 8, kind: input, shape index: {}]   ;;  %s2981_s9 = inlined_call_operand.vmem [shape: f32[1,32], index: 9, kind: input, shape index: {}]   ;;  %s2982_s10 = inlined_call_operand.hbm [shape: f32[16,32], index: 10, kind: output, shape index: {}]  }
   0x1   :  { %17 = vsyncpa [#allocation3 + $0x1], 0  ;;  %s2516_s13 = smov 0   ;;  %s2518_s14 = smov 0  }
   0x2   :  { %s2520_s15 = smov 0   ;;  %s2522_s16 = smov 0  }
   0x3 LB: > { %2984 = sst [smem:[#allocation5_spill]] %s2455_s15  ;;  %s2537_s17 = sadd.s32 4294967295, %s2459_s16   ;;  %s2459_s16 = sphi %s2522_s16, %s2992_s16   ;;  %s2455_s15 = sphi %s2520_s15, %s2989_s15   ;;  %s2451_s14 = sphi %s2518_s14, %s2991_s14   ;;  %s2447_s13 = sphi %s2516_s13, %s2990_s13  }
   0x4   : > { %s1986_s18 = sadd.s32 4294967294, %s2459_s16   ;;  %s2541_s19 = sadd.s32 1, %s2459_s16  }
   0x5   : > { %s250_s20 = sadd.s32 1, %s2455_s15  ;;  %s247_s21 = ssub.s32 %s2459_s16, %s2541_s19 }
   0x6   : > { %p260_p0 = scmp.ne.s32.totalorder %s2455_s15, %s2451_s14  ;;  %p248_p1 = scmp.eq.s32.totalorder %s247_s21, 0 }
   0x7   : > { %p261_p2 = scmp.eq.s32.totalorder %s2537_s17, 1  ;;  %p266_p3 = scmp.ne.s32.totalorder %s2451_s14, %s2447_s13 }
   0x8   : > { %p267_p4 = scmp.eq.s32.totalorder %s1986_s18, 1  ;;  %p1989_p7 = scmp.ge.s32.totalorder %s2459_s16, 1 }
   0x9   : > { %s2552_s22 = scalar_select %p248_p1, %s2455_s15, %s250_s20  }
   0xa   : > { %p2554_p5 = por %p261_p2, %p260_p0  ;;  %p2558_p6 = por %p267_p4, %p266_p3 }
   0xb   : > { %2985 = sst [smem:[#allocation6_spill]] %s2552_s22  ;;  %p323_p8 = scmp.lt.s32.totalorder %s2459_s16, 3 }
   0xd   : > { %p324_p9 = pnand %p1989_p7, %p323_p8 }
   0xe   : > { %p364_p10 = scmp.lt.s32.totalorder (!%p324_p9), %s2537_s17, 1  ;;  %s361_s21 = sand.u32 (!%p324_p9), 1, %s2451_s14  }
   0xf   : > { %327 = sbr.rel (%p324_p9) target bundleno = 879 (0x36f), region = 60  ;;  %s1990_s25 = sshll.u32 (!%p324_p9), %s361_s21, 3 }
  0x10   : > { %s2250_s27 = sshll.u32 (!%p324_p9), %s2537_s17, 3 }
  0x11   : > { %s1910_s30 = scalar_lea.hbm (!%p324_p9), %s2982_s10, %s2250_s27 }
  0x14   : > { %v2254_v0 = vld [vmem:[%s2974_s2 + $0x8] sm:$0xff]  ;;  %v2256_v1 = vld [vmem:[%s2974_s2 + $0x18] sm:$0xff]  ;;  %v2253_v4 = vld [vmem:[%s2974_s2] sm:$0xff]  ;;  %s2584_s26 = scalar_select %p364_p10, %s2537_s17, 1  ;;  %vm547_vm0 = vcmask 261120   ;;  %vm1188_vm1 = vcmask 31744  }
  0x15   : > { %v2258_v2 = vld [vmem:[%s2974_s2 + $0x28] sm:$0xff]  ;;  %v2260_v3 = vld [vmem:[%s2974_s2 + $0x38] sm:$0xff]  ;;  %557 = vmatpush.bf16.msra.mxu0 %v2254_v0  ;;  %582 = vmatpush.bf16.msra.mxu1 %v2256_v1  ;;  %v2255_v5 = vld [vmem:[%s2974_s2 + $0x10] sm:$0xff]  ;;  %vm1397_vm2 = vcmask 64512   ;;  %vm1673_vm3 = vcmask 1043456   ;;  %s363_s17 = scalar_lea.vmem [#allocation2], %s1990_s25 }
  0x16   : > { %607 = vmatpush.bf16.msra.mxu2 %v2258_v2  ;;  %632 = vmatpush.bf16.msra.mxu3 %v2260_v3  ;;  %v2257_v6 = vld [vmem:[%s2974_s2 + $0x20] sm:$0xff]  ;;  %v2259_v7 = vld [vmem:[%s2974_s2 + $0x30] sm:$0xff]  ;;  %s1991_s11 = sshll.u32 %s2584_s26, 2  ;;  %v2262_v8 = vld [vmem:[%s2974_s2 + $0x48] sm:$0xff]  ;;  %s1992_s12 = sshll.u32 %s2584_s26, 3 }
  0x17   : > { %v2264_v9 = vld [vmem:[%s2974_s2 + $0x58] sm:$0xff]  ;;  %s367_s15 = scalar_lea.vmem %s2972_s0, %s1991_s11  ;;  %v2266_v11 = vld [vmem:[%s2974_s2 + $0x68] sm:$0xff]  ;;  %v2261_v13 = vld [vmem:[%s2974_s2 + $0x40] sm:$0xff]  ;;  %s371_s11 = scalar_lea.vmem %s2973_s1, %s1992_s12 }
  0x18   : > { %v2602_v10 = vld [vmem:[%s367_s15] sm:$0xf]  ;;  %v2268_v12 = vld [vmem:[%s2974_s2 + $0x78] sm:$0xff]  ;;  %v2263_v14 = vld [vmem:[%s2974_s2 + $0x50] sm:$0xff]  ;;  %s1912_s22 = sshll.u32 %s363_s17, 4  ;;  %s1900_s26 = scalar_lea.sflag [#allocation3], %s361_s21  ;;  %s1913_s22 = int_to_ptr.vmem [resolvable:$true] %s1912_s22 }
  0x19   : > { %558 = vmatpush.bf16.msra.mxu0 %v2253_v4  ;;  %583 = vmatpush.bf16.msra.mxu1 %v2255_v5  ;;  %v2270_v15 = vld [vmem:[%s2976_s4 + $0x8] sm:$0xff]  ;;  %v2272_v16 = vld [vmem:[%s2976_s4 + $0x18] sm:$0xff]  ;;  %v2265_v17 = vld [vmem:[%s2974_s2 + $0x60] sm:$0xff]  ;;  %s2417_s25 = scalar_lea.hbm %s2982_s10, 16 }
  0x1a   : > { %608 = vmatpush.bf16.msra.mxu2 %v2257_v6  ;;  %633 = vmatpush.bf16.msra.mxu3 %v2259_v7  ;;  %v2267_v18 = vld [vmem:[%s2974_s2 + $0x70] sm:$0xff]  ;;  %v2274_v19 = vld [vmem:[%s2976_s4 + $0x28] sm:$0xff]  ;;  %v2276_v20 = vld [vmem:[%s2976_s4 + $0x38] sm:$0xff] }
  0x1b   : > { %v2269_v21 = vld [vmem:[%s2976_s4] sm:$0xff]  ;;  %v2271_v22 = vld [vmem:[%s2976_s4 + $0x10] sm:$0xff]  ;;  %v2278_v25 = vld [vmem:[%s2976_s4 + $0x48] sm:$0xff] }
  0x1c   : > { %2001 = vmatmul.msk.bf16.vlgmr.msra.gmra.mxu0 %vm547_vm0, %v2602_v10  ;;  %2010 = vmatmul.msk.bf16.vlgmr.msra.gmra.mxu1 %vm547_vm0, %v2602_v10  ;;  %v2273_v23 = vld [vmem:[%s2976_s4 + $0x20] sm:$0xff]  ;;  %v2275_v24 = vld [vmem:[%s2976_s4 + $0x30] sm:$0xff]  ;;  %v2280_v26 = vld [vmem:[%s2976_s4 + $0x58] sm:$0xff] }
  0x1d   : > { %657 = vmatpush.bf16.msrb.mxu0 %v2262_v8  ;;  %682 = vmatpush.bf16.msrb.mxu1 %v2264_v9  ;;  %v2282_v27 = vld [vmem:[%s2976_s4 + $0x68] sm:$0xff]  ;;  %v2284_v28 = vld [vmem:[%s2976_s4 + $0x78] sm:$0xff]  ;;  %v2277_v29 = vld [vmem:[%s2976_s4 + $0x40] sm:$0xff] }
  0x1e   : > { %2019 = vmatmul.msk.bf16.vlgmr.msra.gmra.mxu2 %vm547_vm0, %v2602_v10  ;;  %2028 = vmatmul.msk.bf16.vlgmr.msra.gmra.mxu3 %vm547_vm0, %v2602_v10  ;;  %v2279_v30 = vld [vmem:[%s2976_s4 + $0x50] sm:$0xff]  ;;  %v2281_v31 = vld [vmem:[%s2976_s4 + $0x60] sm:$0xff]  ;;  %v2286_v33 = vld [vmem:[%s2978_s6 + $0x8] sm:$0xff] }
  0x1f   : > { %707 = vmatpush.bf16.msrb.mxu2 %v2266_v11  ;;  %732 = vmatpush.bf16.msrb.mxu3 %v2268_v12  ;;  %v2283_v32 = vld [vmem:[%s2976_s4 + $0x70] sm:$0xff]  ;;  %v2288_v34 = vld [vmem:[%s2978_s6 + $0x18] sm:$0xff]  ;;  %v2290_v35 = vld [vmem:[%s2978_s6 + $0x28] sm:$0xff] }
  0x20   : > { %v2285_v36 = vld [vmem:[%s2978_s6] sm:$0xff]  ;;  %v2287_v37 = vld [vmem:[%s2978_s6 + $0x10] sm:$0xff]  ;;  %v2292_v38 = vld [vmem:[%s2978_s6 + $0x38] sm:$0xff] }
  0x21   : > { %658 = vmatpush.bf16.msrb.mxu0 %v2261_v13  ;;  %683 = vmatpush.bf16.msrb.mxu1 %v2263_v14  ;;  %v2289_v39 = vld [vmem:[%s2978_s6 + $0x20] sm:$0xff]  ;;  %v2291_v40 = vld [vmem:[%s2978_s6 + $0x30] sm:$0xff]  ;;  %v2294_v41 = vld [vmem:[%s2978_s6 + $0x48] sm:$0xff] }
  0x22   : > { %v2296_v42 = vld [vmem:[%s2978_s6 + $0x58] sm:$0xff]  ;;  %v2298_v43 = vld [vmem:[%s2978_s6 + $0x68] sm:$0xff]  ;;  %v2293_v44 = vld [vmem:[%s2978_s6 + $0x40] sm:$0xff] }
  0x23   : > { %708 = vmatpush.bf16.msrb.mxu2 %v2265_v17  ;;  %733 = vmatpush.bf16.msrb.mxu3 %v2267_v18  ;;  %v2295_v45 = vld [vmem:[%s2978_s6 + $0x50] sm:$0xff]  ;;  %v2300_v46 = vld [vmem:[%s2978_s6 + $0x78] sm:$0xff]  ;;  %v2297_v47 = vld [vmem:[%s2978_s6 + $0x60] sm:$0xff] }
  0x24   : > { %v2299_v48 = vld [vmem:[%s2978_s6 + $0x70] sm:$0xff]  ;;  %v2348_v63 = vld [vmem:[%s2977_s5] ss:$0 sm:$0xff]  ;;  %v2349_v0 = vld [vmem:[%s2977_s5 + $0x1] ss:$0 sm:$0xff] }
  0x25   : > { %781 = vmatpush.bf16.msra.mxu0 %v2270_v15  ;;  %806 = vmatpush.bf16.msra.mxu1 %v2272_v16  ;;  %v2340_v3 = vld [vmem:[%s2975_s3] ss:$0 sm:$0xff]  ;;  %v2341_v4 = vld [vmem:[%s2975_s3 + $0x1] ss:$0 sm:$0xff]  ;;  %v2350_v11 = vld [vmem:[%s2977_s5 + $0x2] ss:$0 sm:$0xff] }
  0x26   : > { %v2351_v12 = vld [vmem:[%s2977_s5 + $0x3] ss:$0 sm:$0xff]  ;;  %v2342_v13 = vld [vmem:[%s2975_s3 + $0x2] ss:$0 sm:$0xff] }
  0x27   : > { %831 = vmatpush.bf16.msra.mxu2 %v2274_v19  ;;  %856 = vmatpush.bf16.msra.mxu3 %v2276_v20  ;;  %v2343_v14 = vld [vmem:[%s2975_s3 + $0x3] ss:$0 sm:$0xff] }
  0x29   : > { %782 = vmatpush.bf16.msra.mxu0 %v2269_v21  ;;  %807 = vmatpush.bf16.msra.mxu1 %v2271_v22 }
  0x2b   : > { %832 = vmatpush.bf16.msra.mxu2 %v2273_v23  ;;  %857 = vmatpush.bf16.msra.mxu3 %v2275_v24  ;;  %v2352_v23 = vld [vmem:[%s2977_s5 + $0x4] ss:$0 sm:$0xff]  ;;  %v2353_v24 = vld [vmem:[%s2977_s5 + $0x5] ss:$0 sm:$0xff] }
  0x2c   : > { %2037 = vmatmul.msk.bf16.vlgmr.msrb.gmra.mxu0 %vm547_vm0, %v2602_v10  ;;  %2046 = vmatmul.msk.bf16.vlgmr.msrb.gmra.mxu1 %vm547_vm0, %v2602_v10 }
  0x2d   : > { %881 = vmatpush.bf16.msrb.mxu0 %v2278_v25  ;;  %906 = vmatpush.bf16.msrb.mxu1 %v2280_v26 }
  0x2e   : > { %2055 = vmatmul.msk.bf16.vlgmr.msrb.gmra.mxu2 %vm547_vm0, %v2602_v10  ;;  %2064 = vmatmul.msk.bf16.vlgmr.msrb.gmra.mxu3 %vm547_vm0, %v2602_v10 }
  0x2f   : > { %931 = vmatpush.bf16.msrb.mxu2 %v2282_v27  ;;  %956 = vmatpush.bf16.msrb.mxu3 %v2284_v28  ;;  %v2344_v27 = vld [vmem:[%s2975_s3 + $0x4] ss:$0 sm:$0xff]  ;;  %v2345_v28 = vld [vmem:[%s2975_s3 + $0x5] ss:$0 sm:$0xff] }
  0x31   : > { %882 = vmatpush.bf16.msrb.mxu0 %v2277_v29  ;;  %907 = vmatpush.bf16.msrb.mxu1 %v2279_v30 }
  0x33   : > { %932 = vmatpush.bf16.msrb.mxu2 %v2281_v31  ;;  %957 = vmatpush.bf16.msrb.mxu3 %v2283_v32 }
  0x3c   : > { %2073 = vmatmul.msk.bf16.vlgmr.msra.gmra.mxu0 %vm547_vm0, %v2602_v10  ;;  %2082 = vmatmul.msk.bf16.vlgmr.msra.gmra.mxu1 %vm547_vm0, %v2602_v10 }
  0x3d   : > { %1005 = vmatpush.bf16.msra.mxu0 %v2286_v33  ;;  %1030 = vmatpush.bf16.msra.mxu1 %v2288_v34 }
  0x3e   : > { %2091 = vmatmul.msk.bf16.vlgmr.msra.gmra.mxu2 %vm547_vm0, %v2602_v10  ;;  %2100 = vmatmul.msk.bf16.vlgmr.msra.gmra.mxu3 %vm547_vm0, %v2602_v10 }
  0x3f   : > { %1055 = vmatpush.bf16.msra.mxu2 %v2290_v35  ;;  %1080 = vmatpush.bf16.msra.mxu3 %v2292_v38  ;;  %v2354_v35 = vld [vmem:[%s2977_s5 + $0x6] ss:$0 sm:$0xff]  ;;  %v2347_v38 = vld [vmem:[%s2975_s3 + $0x7] ss:$0 sm:$0xff] }
  0x41   : > { %1006 = vmatpush.bf16.msra.mxu0 %v2285_v36  ;;  %1031 = vmatpush.bf16.msra.mxu1 %v2287_v37  ;;  %v2355_v36 = vld [vmem:[%s2977_s5 + $0x7] ss:$0 sm:$0xff]  ;;  %v2346_v37 = vld [vmem:[%s2975_s3 + $0x6] ss:$0 sm:$0xff] }
  0x43   : > { %1056 = vmatpush.bf16.msra.mxu2 %v2289_v39  ;;  %1081 = vmatpush.bf16.msra.mxu3 %v2291_v40 }
  0x4c   : > { %2109 = vmatmul.msk.bf16.vlgmr.msrb.gmra.mxu0 %vm547_vm0, %v2602_v10  ;;  %2118 = vmatmul.msk.bf16.vlgmr.msrb.gmra.mxu1 %vm547_vm0, %v2602_v10 }
  0x4d   : > { %1105 = vmatpush.bf16.msrb.mxu0 %v2294_v41  ;;  %1130 = vmatpush.bf16.msrb.mxu1 %v2296_v42 }
  0x4e   : > { %2127 = vmatmul.msk.bf16.vlgmr.msrb.gmra.mxu2 %vm547_vm0, %v2602_v10  ;;  %2136 = vmatmul.msk.bf16.vlgmr.msrb.gmra.mxu3 %vm547_vm0, %v2602_v10 }
  0x4f   : > { %1155 = vmatpush.bf16.msrb.mxu2 %v2298_v43  ;;  %1180 = vmatpush.bf16.msrb.mxu3 %v2300_v46 }
  0x51   : > { %1106 = vmatpush.bf16.msrb.mxu0 %v2293_v44  ;;  %1131 = vmatpush.bf16.msrb.mxu1 %v2295_v45 }
  0x53   : > { %1156 = vmatpush.bf16.msrb.mxu2 %v2297_v47  ;;  %1181 = vmatpush.bf16.msrb.mxu3 %v2299_v48 }
  0x5c   : > { %2145 = vmatmul.msk.bf16.vlgmr.msra.gmra.mxu0 %vm547_vm0, %v2602_v10  ;;  %2154 = vmatmul.msk.bf16.vlgmr.msra.gmra.mxu1 %vm547_vm0, %v2602_v10 }
  0x5e   : > { %2163 = vmatmul.msk.bf16.vlgmr.msra.gmra.mxu2 %vm547_vm0, %v2602_v10  ;;  %2172 = vmatmul.msk.bf16.vlgmr.msra.gmra.mxu3 %vm547_vm0, %v2602_v10 }
  0x6c   : > { %2181 = vmatmul.msk.bf16.vlgmr.msrb.gmra.mxu0 %vm547_vm0, %v2602_v10  ;;  %2190 = vmatmul.msk.bf16.vlgmr.msrb.gmra.mxu1 %vm547_vm0, %v2602_v10 }
  0x6e   : > { %2199 = vmatmul.msk.bf16.vlgmr.msrb.gmra.mxu2 %vm547_vm0, %v2602_v10  ;;  %2208 = vmatmul.msk.bf16.vlgmr.msrb.gmra.mxu3 %vm547_vm0, %v2602_v10 }
  0x99   : > { %v560_v49 = vpop.f32.mrf.mxu0  ;;  %v585_v50 = vpop.f32.mrf.mxu1 }
  0x9a   : > { %v561_v9 = vadd.f32 %v2340_v3, %v560_v49  ;;  %v586_v10 = vadd.f32 %v2341_v4, %v585_v50  ;;  %v2356_v49 = vld [vmem:[%s2979_s7] ss:$0 sm:$0xff]  ;;  %v2357_v50 = vld [vmem:[%s2979_s7 + $0x1] ss:$0 sm:$0xff] }
  0xa1   : > { %v610_v51 = vpop.f32.mrf.mxu2  ;;  %v635_v52 = vpop.f32.mrf.mxu3 }
  0xa2   : > { %v562_v53 = vpop.f32.mrf.mxu0  ;;  %v587_v54 = vpop.f32.mrf.mxu1  ;;  %v611_v21 = vadd.f32 %v2342_v13, %v610_v51  ;;  %v636_v22 = vadd.f32 %v2343_v14, %v635_v52 }
  0xa9   : > { %v612_v55 = vpop.f32.mrf.mxu2  ;;  %v637_v56 = vpop.f32.mrf.mxu3 }
  0xaa   : > { %v660_v57 = vpop.f32.mrf.mxu0  ;;  %v685_v58 = vpop.f32.mrf.mxu1  ;;  %v2358_v55 = vld [vmem:[%s2979_s7 + $0x2] ss:$0 sm:$0xff] }
  0xab   : > { %v661_v33 = vadd.f32 %v2344_v27, %v660_v57  ;;  %v686_v34 = vadd.f32 %v2345_v28, %v685_v58 }
  0xb1   : > { %v2766_v59 = vpop.f32.mrf.mxu2  ;;  %v2768_v60 = vpop.f32.mrf.mxu3 }
  0xb2   : > { %v662_v61 = vpop.f32.mrf.mxu0  ;;  %v687_v62 = vpop.f32.mrf.mxu1  ;;  %v711_v45 = vadd.f32 %v2346_v37, %v2766_v59  ;;  %v736_v46 = vadd.f32 %v2347_v38, %v2768_v60  ;;  %v2359_v60 = vld [vmem:[%s2979_s7 + $0x3] ss:$0 sm:$0xff] }
  0xb9   : > { %v712_v1 = vpop.f32.mrf.mxu2  ;;  %v737_v2 = vpop.f32.mrf.mxu3 }
  0xba   : > { %v784_v5 = vpop.f32.mrf.mxu0  ;;  %v809_v6 = vpop.f32.mrf.mxu1 }
  0xbb   : > { %v785_v7 = vadd.f32 %v2348_v63, %v784_v5  ;;  %v810_v8 = vadd.f32 %v2349_v0, %v809_v6  ;;  %v2360_v63 = vld [vmem:[%s2979_s7 + $0x4] ss:$0 sm:$0xff]  ;;  %v2361_v0 = vld [vmem:[%s2979_s7 + $0x5] ss:$0 sm:$0xff] }
  0xbd   : > { %2209 = vmatpush.xpose.msk.msra.mxu0 %vm1188_vm1, %v785_v7  ;;  %2211 = vmatpush.xpose.msk.msra.mxu1 %vm1188_vm1, %v810_v8  ;;  %v2362_v7 = vld [vmem:[%s2979_s7 + $0x6] ss:$0 sm:$0xff] }
  0xc0   : > { %2210 = vmatmul.msk.f32.vlgmr.msra.gmra.mxu0 %vm1188_vm1, %v561_v9  ;;  %2212 = vmatmul.msk.f32.vlgmr.msra.gmra.mxu1 %vm1188_vm1, %v586_v10 }
  0xc1   : > { %v834_v15 = vpop.f32.mrf.mxu2  ;;  %v859_v16 = vpop.f32.mrf.mxu3 }
  0xc2   : > { %v835_v17 = vadd.f32 %v2350_v11, %v834_v15  ;;  %v860_v18 = vadd.f32 %v2351_v12, %v859_v16  ;;  %v786_v19 = vpop.f32.mrf.mxu0  ;;  %v811_v20 = vpop.f32.mrf.mxu1  ;;  %v2363_v12 = vld [vmem:[%s2979_s7 + $0x7] ss:$0 sm:$0xff] }
  0xc4   : > { %2213 = vmatpush.xpose.msk.msra.mxu2 %vm1188_vm1, %v835_v17  ;;  %2215 = vmatpush.xpose.msk.msra.mxu3 %vm1188_vm1, %v860_v18  ;;  %v1187_v17 = vld [vmem:[%s371_s11] sm:$0xff]  ;;  %s1914_s11 = sshll.u32 %s1910_s30, 4  ;;  %s1915_s11 = int_to_ptr.hbm [resolvable:$true] %s1914_s11 }
  0xc5   : > { %s2411_s15 = sshra.s32 %s1915_s11, 4  ;;  %s2412_s15 = int_to_ptr.hbm [resolvable:$true] %s2411_s15 }
  0xc6   : > { %s2413_s20 = scalar_lea.hbm %s2412_s15, 8  ;;  %p2418_p0 = scmp.lt.s32.totalorder %s2412_s15, %s2982_s10 }
  0xc7   : > { %2214 = vmatmul.msk.f32.vlgmr.msra.gmra.mxu2 %vm1188_vm1, %v611_v21  ;;  %2216 = vmatmul.msk.f32.vlgmr.msra.gmra.mxu3 %vm1188_vm1, %v636_v22  ;;  %p2414_p11 = scmp.ne.s32.totalorder %s2412_s15, %s2413_s20  ;;  %p2419_p1 = scmp.lt.s32.totalorder %s2417_s25, %s2413_s20 }
  0xc9   : > { %v836_v25 = vpop.f32.mrf.mxu2  ;;  %v861_v26 = vpop.f32.mrf.mxu3  ;;  %p2415_p12 = pnand %p2414_p11, %p2554_p5  ;;  %p2420_p2 = por %p2419_p1, %p2418_p0 }
  0xca   : > { %v884_v29 = vpop.f32.mrf.mxu0  ;;  %v909_v30 = vpop.f32.mrf.mxu1 }
  0xcb   : > { %v885_v31 = vadd.f32 %v2352_v23, %v884_v29  ;;  %v910_v32 = vadd.f32 %v2353_v24, %v909_v30  ;;  %p2416_p13 = pneg %p2415_p12 }
  0xcd   : > { %2217 = vmatpush.xpose.msk.msrb.mxu0 %vm1188_vm1, %v885_v31  ;;  %2219 = vmatpush.xpose.msk.msrb.mxu1 %vm1188_vm1, %v910_v32  ;;  %p2421_p3 = pnand %p2420_p2, %p2416_p13 }
  0xd0   : > { %2218 = vmatmul.msk.f32.vlgmr.msrb.gmra.mxu0 %vm1188_vm1, %v661_v33  ;;  %2220 = vmatmul.msk.f32.vlgmr.msrb.gmra.mxu1 %vm1188_vm1, %v686_v34 }
  0xd1   : > { %v934_v39 = vpop.f32.mrf.mxu2  ;;  %v959_v40 = vpop.f32.mrf.mxu3 }
  0xd2   : > { %v935_v41 = vadd.f32 %v2354_v35, %v934_v39  ;;  %v960_v42 = vadd.f32 %v2355_v36, %v959_v40  ;;  %v886_v43 = vpop.f32.mrf.mxu0  ;;  %v911_v44 = vpop.f32.mrf.mxu1 }
  0xd4   : > { %2221 = vmatpush.xpose.msk.msrb.mxu2 %vm1188_vm1, %v935_v41  ;;  %2223 = vmatpush.xpose.msk.msrb.mxu3 %vm1188_vm1, %v960_v42 }
  0xd7   : > { %2222 = vmatmul.msk.f32.vlgmr.msrb.gmra.mxu2 %vm1188_vm1, %v711_v45  ;;  %2224 = vmatmul.msk.f32.vlgmr.msrb.gmra.mxu3 %vm1188_vm1, %v736_v46 }
  0xd9   : > { %v936_v47 = vpop.f32.mrf.mxu2  ;;  %v961_v48 = vpop.f32.mrf.mxu3 }
  0xda   : > { %v1008_v51 = vpop.f32.mrf.mxu0  ;;  %v1033_v52 = vpop.f32.mrf.mxu1 }
  0xdb   : > { %v1009_v53 = vadd.f32 %v2356_v49, %v1008_v51  ;;  %v1034_v54 = vadd.f32 %v2357_v50, %v1033_v52 }
  0xdd   : > { %1504 = vmatpush.msra.mxu0 %v1009_v53  ;;  %1527 = vmatpush.msra.mxu1 %v1034_v54 }
  0xe1   : > { %v1058_v56 = vpop.f32.mrf.mxu2  ;;  %v1083_v61 = vpop.f32.mrf.mxu3 }
  0xe2   : > { %v1010_v57 = vpop.f32.mrf.mxu0  ;;  %v1035_v58 = vpop.f32.mrf.mxu1  ;;  %v1059_v59 = vadd.f32 %v2358_v55, %v1058_v56  ;;  %v1084_v62 = vadd.f32 %v2359_v60, %v1083_v61 }
  0xe4   : > { %1550 = vmatpush.msra.mxu2 %v1059_v59  ;;  %1573 = vmatpush.msra.mxu3 %v1084_v62 }
  0xe9   : > { %v1060_v1 = vpop.f32.mrf.mxu2  ;;  %v1085_v6 = vpop.f32.mrf.mxu3 }
  0xea   : > { %v1108_v2 = vpop.f32.mrf.mxu0  ;;  %v1133_v3 = vpop.f32.mrf.mxu1 }
  0xeb   : > { %v1109_v4 = vadd.f32 %v2360_v63, %v1108_v2  ;;  %v1134_v5 = vadd.f32 %v2361_v0, %v1133_v3 }
  0xed   : > { %1596 = vmatpush.msrb.mxu0 %v1109_v4  ;;  %1619 = vmatpush.msrb.mxu1 %v1134_v5 }
  0xf1   : > { %v1158_v8 = vpop.f32.mrf.mxu2  ;;  %v1183_v13 = vpop.f32.mrf.mxu3 }
  0xf2   : > { %v1110_v9 = vpop.f32.mrf.mxu0  ;;  %v1135_v10 = vpop.f32.mrf.mxu1  ;;  %v1159_v11 = vadd.f32 %v2362_v7, %v1158_v8  ;;  %v1184_v14 = vadd.f32 %v2363_v12, %v1183_v13 }
  0xf4   : > { %1642 = vmatpush.msrb.mxu2 %v1159_v11  ;;  %1665 = vmatpush.msrb.mxu3 %v1184_v14 }
  0xf9   : > { %v1160_v15 = vpop.f32.mrf.mxu2  ;;  %v1185_v16 = vpop.f32.mrf.mxu3 }
 0x13d   : > { %v1212_v18 = vpop.f32.mrf.mxu0  ;;  %v1238_v19 = vpop.f32.mrf.mxu1 }
 0x13e   : > { %v1213_v20 = vadd.f32 %v1212_v18, %v1187_v17  ;;  %v1239_v21 = vadd.f32 %v1238_v19, %v1187_v17 }
 0x140   : > { %v1401_v22 = vsel %vm1397_vm2, %v1239_v21, -inf  ;;  %v1398_v23 = vsel %vm1397_vm2, %v1213_v20, -inf }
 0x141   : > { %1402 = vmax.xlane.f32.xlu2 %v1401_v22  ;;  %1399 = vmax.xlane.f32.xlu1 %v1398_v23 }
 0x14a   : > { %v1264_v24 = vpop.f32.mrf.mxu2  ;;  %v1290_v27 = vpop.f32.mrf.mxu3 }
 0x14b   : > { %v1265_v25 = vadd.f32 %v1264_v24, %v1187_v17  ;;  %v1291_v28 = vadd.f32 %v1290_v27, %v1187_v17 }
 0x14d   : > { %v1404_v26 = vsel %vm1397_vm2, %v1265_v25, -inf  ;;  %v1407_v29 = vsel %vm1397_vm2, %v1291_v28, -inf  ;;  %v1316_v30 = vpop.f32.mrf.mxu0  ;;  %v1342_v39 = vpop.f32.mrf.mxu1 }
 0x14e   : > { %1405 = vmax.xlane.f32.xlu0 %v1404_v26  ;;  %v1317_v31 = vadd.f32 %v1316_v30, %v1187_v17  ;;  %v1343_v40 = vadd.f32 %v1342_v39, %v1187_v17 }
 0x150   : > { %v1410_v37 = vsel %vm1397_vm2, %v1317_v31, -inf  ;;  %v1413_v41 = vsel %vm1397_vm2, %v1343_v40, -inf }
 0x156   : > { %1408 = vmax.xlane.f32.xlu0 %v1407_v29 }
 0x15a   : > { %v1368_v32 = vpop.f32.mrf.mxu2  ;;  %v1394_v33 = vpop.f32.mrf.mxu3 }
 0x15b   : > { %v1369_v34 = vadd.f32 %v1368_v32, %v1187_v17  ;;  %v1395_v35 = vadd.f32 %v1394_v33, %v1187_v17 }
 0x15d   : > { %v1419_v36 = vsel %vm1397_vm2, %v1395_v35, -inf  ;;  %v1416_v38 = vsel %vm1397_vm2, %v1369_v34, -inf }
 0x15e   : > { %1420 = vmax.xlane.f32.xlu2 %v1419_v36  ;;  %1411 = vmax.xlane.f32.xlu0 %v1410_v37 }
 0x15f   : > { %1417 = vmax.xlane.f32.xlu1 %v1416_v38 }
 0x167   : > { %1414 = vmax.xlane.f32.xlu1 %v1413_v41 }
 0x1b4   : > { %v1400_v42 = vpop.xlane.xlu1 %1399  ;;  %v1403_v50 = vpop.xlane.xlu2 %1402 }
 0x1b5   : > { %v1422_v43 = vsub.f32 %v1213_v20, %v1400_v42  ;;  %v1423_v54 = vsub.f32 %v1239_v21, %v1403_v50  ;;  %v493_v42 = vld [vmem:[%s2980_s8] sm:$0x3] }
 0x1b7   : > { %v1430_v44 = vmul.f32 1.442695, %v1422_v43  ;;  %v1432_v57 = vmul.f32 1.442695, %v1423_v54  ;;  %v501_v43 = vunpack.c.l.bf16 %v493_v42 }
 0x1b9   : > { %2365 = vpow2.f32 %v1430_v44  ;;  %v495_v44 = vld [vmem:[%s2980_s8 + $0x4] sm:$0x3] }
 0x1bf   : > { %v2366_v45 = vpop.eup %2365 }
 0x1c0   : > { %v1446_v47 = vsel %vm1397_vm2, %v2366_v45, 0.0 }
 0x1c1   : > { %v1406_v46 = vpop.xlane.xlu0 %1405  ;;  %1447 = vadd.xlane.f32.xlu1 %v1446_v47 }
 0x1c2   : > { %v1424_v48 = vsub.f32 %v1265_v25, %v1406_v46  ;;  %v496_v46 = vld [vmem:[%s2980_s8 + $0x6] sm:$0x3] }
 0x1c3   : > { %v504_v47 = vunpack.c.l.bf16 %v496_v46 }
 0x1c4   : > { %v1434_v49 = vmul.f32 1.442695, %v1424_v48  ;;  %v494_v48 = vld [vmem:[%s2980_s8 + $0x2] sm:$0x3] }
 0x1c6   : > { %2367 = vpow2.f32 %v1434_v49  ;;  %v502_v49 = vunpack.c.l.bf16 %v494_v48 }
 0x1c9   : > { %v1409_v51 = vpop.xlane.xlu0 %1408 }
 0x1ca   : > { %v1425_v52 = vsub.f32 %v1291_v28, %v1409_v51  ;;  %v499_v51 = vld [vmem:[%s2980_s8 + $0xc] sm:$0x3] }
 0x1cc   : > { %v2368_v53 = vpop.eup %2367  ;;  %v1436_v55 = vmul.f32 1.442695, %v1425_v52  ;;  %v500_v52 = vld [vmem:[%s2980_s8 + $0xe] sm:$0x3] }
 0x1cd   : > { %v1452_v56 = vsel %vm1397_vm2, %v2368_v53, 0.0  ;;  %v508_v54 = vunpack.c.l.bf16 %v500_v52 }
 0x1ce   : > { %2369 = vpow2.f32 %v1436_v55  ;;  %1453 = vadd.xlane.f32.xlu2 %v1452_v56  ;;  %v497_v55 = vld [vmem:[%s2980_s8 + $0x8] sm:$0x3]  ;;  %v498_v56 = vld [vmem:[%s2980_s8 + $0xa] sm:$0x3] }
 0x1cf   : > { %2371 = vpow2.f32 %v1432_v57  ;;  %v505_v57 = vunpack.c.l.bf16 %v497_v55 }
 0x1d1   : > { %v1421_v58 = vpop.xlane.xlu2 %1420  ;;  %v1412_v61 = vpop.xlane.xlu0 %1411 }
 0x1d2   : > { %v1429_v59 = vsub.f32 %v1395_v35, %v1421_v58  ;;  %v1418_v60 = vpop.xlane.xlu1 %1417  ;;  %v1426_v3 = vsub.f32 %v1317_v31, %v1412_v61  ;;  %v506_v58 = vunpack.c.l.bf16 %v498_v56 }
 0x1d3   : > { %v1428_v62 = vsub.f32 %v1369_v34, %v1418_v60 }
 0x1d4   : > { %v2370_v63 = vpop.eup %2369  ;;  %v1444_v0 = vmul.f32 1.442695, %v1429_v59  ;;  %v1438_v5 = vmul.f32 1.442695, %v1426_v3 }
 0x1d5   : > { %v1442_v1 = vmul.f32 1.442695, %v1428_v62  ;;  %v1455_v2 = vsel %vm1397_vm2, %v2370_v63, 0.0  ;;  %v2372_v4 = vpop.eup %2371 }
 0x1d6   : > { %2373 = vpow2.f32 %v1444_v0  ;;  %1456 = vadd.xlane.f32.xlu0 %v1455_v2  ;;  %v1449_v10 = vsel %vm1397_vm2, %v2372_v4, 0.0 }
 0x1d7   : > { %2375 = vpow2.f32 %v1442_v1 }
 0x1d8   : > { %2377 = vpow2.f32 %v1438_v5 }
 0x1da   : > { %v1415_v6 = vpop.xlane.xlu1 %1414 }
 0x1db   : > { %v1427_v7 = vsub.f32 %v1343_v40, %v1415_v6 }
 0x1dc   : > { %v2374_v8 = vpop.eup %2373 }
 0x1dd   : > { %v1440_v9 = vmul.f32 1.442695, %v1427_v7  ;;  %v1467_v11 = vsel %vm1397_vm2, %v2374_v8, 0.0  ;;  %v2376_v12 = vpop.eup %2375 }
 0x1de   : > { %1450 = vadd.xlane.f32.xlu0 %v1449_v10  ;;  %1468 = vadd.xlane.f32.xlu1 %v1467_v11  ;;  %v1464_v13 = vsel %vm1397_vm2, %v2376_v12, 0.0  ;;  %v2378_v14 = vpop.eup %2377 }
 0x1df   : > { %2379 = vpow2.f32 %v1440_v9  ;;  %1465 = vadd.xlane.f32.xlu2 %v1464_v13  ;;  %v1458_v17 = vsel %vm1397_vm2, %v2378_v14, 0.0 }
 0x1e5   : > { %v2380_v15 = vpop.eup %2379 }
 0x1e6   : > { %v1461_v16 = vsel %vm1397_vm2, %v2380_v15, 0.0 }
 0x1e7   : > { %1462 = vadd.xlane.f32.xlu0 %v1461_v16  ;;  %1459 = vadd.xlane.f32.xlu2 %v1458_v17 }
 0x234   : > { %v1448_v18 = vpop.xlane.xlu1 %1447 }
 0x235   : > { %2381 = vrcp.f32 %v1448_v18 }
 0x23b   : > { %v2382_v19 = vpop.eup %2381 }
 0x23c   : > { %v1478_v20 = vmul.f32 %v2382_v19, %v2366_v45  ;;  %v503_v45 = vunpack.c.l.bf16 %v495_v44 }
 0x23e   : > { %2225 = vmatmul.msk.f32.vlgmr.msra.gmra.mxu0 %vm1397_vm2, %v1478_v20 }
 0x23f   : > { %2233 = vmatpush.msk.msra.mxu0 %vm1673_vm3, %v501_v43 }
 0x241   : > { %v1454_v21 = vpop.xlane.xlu2 %1453 }
 0x242   : > { %2383 = vrcp.f32 %v1454_v21 }
 0x248   : > { %v2384_v22 = vpop.eup %2383 }
 0x249   : > { %v1480_v23 = vmul.f32 %v2384_v22, %v2368_v53  ;;  %v1457_v24 = vpop.xlane.xlu0 %1456  ;;  %v507_v53 = vunpack.c.l.bf16 %v499_v51 }
 0x24a   : > { %2385 = vrcp.f32 %v1457_v24 }
 0x24b   : > { %2227 = vmatmul.msk.f32.vlgmr.msra.gmra.mxu2 %vm1397_vm2, %v1480_v23  ;;  %v2364_v23 = vld [vmem:[%s2981_s9] ss:$0 sm:$0xff] }
 0x24c   : > { %2237 = vmatpush.msk.msra.mxu2 %vm1673_vm3, %v503_v45 }
 0x250   : > { %v2386_v25 = vpop.eup %2385 }
 0x251   : > { %v1481_v26 = vmul.f32 %v2386_v25, %v2370_v63  ;;  %v1451_v27 = vpop.xlane.xlu0 %1450  ;;  %v1469_v28 = vpop.xlane.xlu1 %1468 }
 0x252   : > { %2387 = vrcp.f32 %v1451_v27  ;;  %v1466_v29 = vpop.xlane.xlu2 %1465 }
 0x253   : > { %2389 = vrcp.f32 %v1469_v28  ;;  %2228 = vmatmul.msk.f32.vlgmr.msra.gmra.mxu3 %vm1397_vm2, %v1481_v26 }
 0x254   : > { %2391 = vrcp.f32 %v1466_v29  ;;  %2239 = vmatpush.msk.msra.mxu3 %vm1673_vm3, %v504_v47 }
 0x258   : > { %v2388_v30 = vpop.eup %2387 }
 0x259   : > { %v2390_v31 = vpop.eup %2389  ;;  %v1479_v32 = vmul.f32 %v2388_v30, %v2372_v4 }
 0x25a   : > { %v2392_v33 = vpop.eup %2391  ;;  %v1485_v34 = vmul.f32 %v2390_v31, %v2374_v8  ;;  %v1463_v35 = vpop.xlane.xlu0 %1462 }
 0x25b   : > { %v1484_v36 = vmul.f32 %v2392_v33, %v2376_v12  ;;  %v1460_v37 = vpop.xlane.xlu2 %1459  ;;  %2393 = vrcp.f32 %v1463_v35  ;;  %2226 = vmatmul.msk.f32.vlgmr.msra.gmra.mxu1 %vm1397_vm2, %v1479_v32 }
 0x25c   : > { %2395 = vrcp.f32 %v1460_v37  ;;  %2232 = vmatmul.msk.f32.vlgmr.msrb.gmra.mxu3 %vm1397_vm2, %v1485_v34  ;;  %2235 = vmatpush.msk.msra.mxu1 %vm1673_vm3, %v502_v49 }
 0x25d   : > { %2231 = vmatmul.msk.f32.vlgmr.msrb.gmra.mxu2 %vm1397_vm2, %v1484_v36  ;;  %2247 = vmatpush.msk.msrb.mxu3 %vm1673_vm3, %v508_v54 }
 0x25e   : > { %2245 = vmatpush.msk.msrb.mxu2 %vm1673_vm3, %v507_v53 }
 0x261   : > { %v2394_v38 = vpop.eup %2393 }
 0x262   : > { %v2396_v39 = vpop.eup %2395  ;;  %v1483_v40 = vmul.f32 %v2394_v38, %v2380_v15 }
 0x263   : > { %v1482_v41 = vmul.f32 %v2396_v39, %v2378_v14 }
 0x264   : > { %2230 = vmatmul.msk.f32.vlgmr.msrb.gmra.mxu1 %vm1397_vm2, %v1483_v40 }
 0x265   : > { %2229 = vmatmul.msk.f32.vlgmr.msrb.gmra.mxu0 %vm1397_vm2, %v1482_v41  ;;  %2243 = vmatpush.msk.msrb.mxu1 %vm1673_vm3, %v506_v58 }
 0x266   : > { %2241 = vmatpush.msk.msrb.mxu0 %vm1673_vm3, %v505_v57 }
 0x2bb   : > { %v1506_v50 = vpop.f32.mrf.mxu0 }
 0x2bc   : > { %2234 = vmatmul.msk.f32.vlgmr.msra.gmra.mxu0 %vm1188_vm1, %v1506_v50 }
 0x2ce   : > { %v1552_v59 = vpop.f32.mrf.mxu2 }
 0x2cf   : > { %2238 = vmatmul.msk.f32.vlgmr.msra.gmra.mxu2 %vm1188_vm1, %v1552_v59 }
 0x2d6   : > { %v1575_v60 = vpop.f32.mrf.mxu3 }
 0x2d7   : > { %2240 = vmatmul.msk.f32.vlgmr.msra.gmra.mxu3 %vm1188_vm1, %v1575_v60 }
 0x2d8   : > { %v1529_v61 = vpop.f32.mrf.mxu1 }
 0x2d9   : > { %2236 = vmatmul.msk.f32.vlgmr.msra.gmra.mxu1 %vm1188_vm1, %v1529_v61 }
 0x2df   : > { %v1667_v62 = vpop.f32.mrf.mxu3 }
 0x2e0   : > { %v1644_v63 = vpop.f32.mrf.mxu2  ;;  %2248 = vmatmul.msk.f32.vlgmr.msrb.gmra.mxu3 %vm1188_vm1, %v1667_v62 }
 0x2e1   : > { %2246 = vmatmul.msk.f32.vlgmr.msrb.gmra.mxu2 %vm1188_vm1, %v1644_v63  ;;  %v1621_v0 = vpop.f32.mrf.mxu1 }
 0x2e2   : > { %v1598_v1 = vpop.f32.mrf.mxu0  ;;  %2244 = vmatmul.msk.f32.vlgmr.msrb.gmra.mxu1 %vm1188_vm1, %v1621_v0 }
 0x2e3   : > { %2242 = vmatmul.msk.f32.vlgmr.msrb.gmra.mxu0 %vm1188_vm1, %v1598_v1 }
 0x339   : > { %v1694_v2 = vpop.f32.mrf.mxu0 }
 0x33a   : > { %v1879_v4 = vsel %vm547_vm0, %v1694_v2, 0.0 }
 0x352   : > { %v1746_v6 = vpop.f32.mrf.mxu2 }
 0x353   : > { %v1882_v9 = vsel %vm547_vm0, %v1746_v6, 0.0 }
 0x356   : > { %v1720_v3 = vpop.f32.mrf.mxu1 }
 0x357   : > { %v1880_v5 = vsel %vm547_vm0, %v1720_v3, 0.0 }
 0x358   : > { %v1881_v7 = vadd.f32 %v1880_v5, %v1879_v4 }
 0x35a   : > { %v1772_v8 = vpop.f32.mrf.mxu3  ;;  %v1883_v10 = vadd.f32 %v1882_v9, %v1881_v7 }
 0x35b   : > { %v1884_v11 = vsel %vm547_vm0, %v1772_v8, 0.0 }
 0x35c   : > { %v1885_v12 = vadd.f32 %v1884_v11, %v1883_v10 }
 0x35f   : > { %v1824_v14 = vpop.f32.mrf.mxu1 }
 0x360   : > { %v1798_v13 = vpop.f32.mrf.mxu0  ;;  %v1888_v17 = vsel %vm547_vm0, %v1824_v14, 0.0 }
 0x361   : > { %v1886_v15 = vsel %vm547_vm0, %v1798_v13, 0.0 }
 0x362   : > { %v1887_v16 = vadd.f32 %v1886_v15, %v1885_v12 }
 0x363   : > { %v1876_v20 = vpop.f32.mrf.mxu3 }
 0x364   : > { %v1889_v18 = vadd.f32 %v1888_v17, %v1887_v16  ;;  %v1850_v19 = vpop.f32.mrf.mxu2  ;;  %v1892_v24 = vsel %vm547_vm0, %v1876_v20, 0.0 }
 0x365   : > { %v1890_v21 = vsel %vm547_vm0, %v1850_v19, 0.0 }
 0x366   : > { %v1891_v22 = vadd.f32 %v1890_v21, %v1889_v18 }
 0x368   : > { %v1893_v25 = vadd.f32 %v1892_v24, %v1891_v22 }
 0x36a   : > { %v1897_v26 = vadd.f32 %v2364_v23, %v1893_v25 }
 0x36c   : > { %1898 = vst.msk [vmem:[%s363_s17] sm:$0xff] %vm547_vm0, %v1897_v26 }
 0x36d   : > { %2424 = shalt.err (!%p2421_p3)
}
 0x36e   : > { %2301 = dma.vmem_to_hbm [thread:$0]  (%p2554_p5), %s1913_s22, 128, %s1915_s11, %s1900_s26  }
 0x36f PF: > { %p2307_p4 = scmp.ge.s32.totalorder %s2459_s16, 2  ;;  %s1926_s21 = sand.u32 1, %s2447_s13  }
 0x370   : > { %s1927_s12 = scalar_lea.sflag [#allocation3], %s1926_s21 }
 0x371   : > { %p2304_p7 = pnand %p2307_p4, %p2558_p6 }
 0x373   : > { %p2305_p8 = pneg %p2304_p7 }
 0x375   : > { %2442 = dma.done.wait (%p2305_p8), %s1927_s12, 128  }
 0x376   : > { %2444 = vsyncadd (%p2305_p8), %s1927_s12, 4294967168  ;;  %s2988_s18 = sld [smem:[#allocation5_spill]]  ;;  %p20_p9 = scmp.ge.s32.totalorder %s2541_s19, 4  }
 0x377   : > { %s2989_s15 = sld [smem:[#allocation6_spill]]  ;;  %s2990_s13 = smov %s2451_s14 }
 0x378   : > { %s2992_s16 = smov %s2541_s19  ;;  %22 = sbr.rel (!%p20_p9) target bundleno = 3 (0x3), region = 98 }
 0x37c   : > { %s2991_s14 = smov %s2988_s18 }
 0x37d   :  { %1933 = vsyncpa [#allocation3], 1 }
 0x37e   :  { %1935 = vsyncpa [#allocation3 + $0x1], 1 }

</bundles_post_ra>
